<compile_context>
chip_gen: v7x
topology: tpu7x:2x2x1
jax: 0.10.0
libtpu: 0.0.40
codegen_flags: <defaults>
</compile_context>

<pallas_src>
import jax
import jax.numpy as jnp
from jax import lax
from jax.experimental import pallas as pl
from jax.experimental.pallas import tpu as pltpu

EPS = 1e-5
_MB = 1024 * 1024
_LANE = 128
_MIN_BLOCKS = 8               # keep both v7x TCs fed + pipelining alive
_MAX_ROW_TILE = 1024          # caps lane-padded (row_tile, 1) sidecar VMEM cost
_TARGET_BLOCK_BYTES = 4 * _MB  # safe on v5e/v6e/v7x with explicit vmem limit
_VMEM_LIMIT_CAP = 48 * _MB     # headroom under v7x's 64 MiB physical VMEM


def fbn_kernel(scale_ref, shift_ref, x_ref, o_ref):
    # scale/shift: (row_tile, 1) or (1, lane_tile) f32 -> broadcast FMA over the x block.
    x = x_ref[...].astype(jnp.float32)
    o_ref[...] = (x * scale_ref[...] + shift_ref[...]).astype(o_ref.dtype)


def _sublane_multiple(itemsize):
    # f32 -> 8 rows/vreg, bf16 -> 16, int8/fp8 -> 32 (packed sublanes).
    return {1: 32, 2: 16, 4: 8, 8: 8}.get(int(itemsize), 8)


def _round_down(v, m):
    return (v // m) * m


def _choose_tiles(rows, cols, itemsize, target_block_bytes):
    """Pick (row_tile, lane_tile). `cols` is always a multiple of 128 here."""
    sub = _sublane_multiple(itemsize)
    target_elems = max(1, target_block_bytes // itemsize)

    # Lane tile: full extent if a minimal-row block fits the budget, else a 128 multiple.
    if cols * sub <= target_elems or cols <= _LANE:
        lane_tile = cols
    else:
        lane_tile = max(_LANE, _round_down(target_elems // sub, _LANE))
        lane_tile = min(lane_tile, cols)

    # Row tile: fill the rest of the block budget, dtype-native sublane multiple.
    rows_per_block = max(1, target_elems // max(1, lane_tile))
    if rows <= sub or rows_per_block >= rows:
        row_tile = rows if rows <= _MAX_ROW_TILE else _round_down(_MAX_ROW_TILE, sub)
    else:
        row_tile = max(sub, _round_down(rows_per_block, sub))
    row_tile = min(row_tile, rows, _MAX_ROW_TILE)

    # Grid-collapse guard: for big-enough tensors, make sure we emit >= _MIN_BLOCKS blocks.
    def nblocks(rt, lt):
        return pl.cdiv(rows, rt) * pl.cdiv(cols, lt)

    big_enough = rows * cols * itemsize >= _MIN_BLOCKS * 128 * 1024
    if big_enough:
        for _ in range(64):
            if nblocks(row_tile, lane_tile) >= _MIN_BLOCKS:
                break
            if row_tile > sub:
                row_tile = max(sub, _round_down(row_tile // 2, sub))
            elif lane_tile > _LANE:
                lane_tile = max(_LANE, _round_down(lane_tile // 2, _LANE))
            else:
                break
    return row_tile, lane_tile


def frozen_batch_norm_2d(x, weight, bias, running_mean, running_var, *, eps=EPS,
                         target_block_bytes=_TARGET_BLOCK_BYTES):
    N, C, H, W = x.shape
    HW = H * W
    NC = N * C
    CHW = C * HW
    itemsize = jnp.dtype(x.dtype).itemsize

    # ---- Precompute per-channel affine once, in f32 (cheap wrapper work). ----
    w = weight.astype(jnp.float32)
    b = bias.astype(jnp.float32)
    rm = running_mean.astype(jnp.float32)
    rv = running_var.astype(jnp.float32)
    scale_c = w * lax.rsqrt(rv + jnp.float32(eps))
    shift_c = b - rm * scale_c

    # ---- Choose a lane-dense 2-D view + matching scale/shift layout. ----
    pad = 0
    if HW % _LANE == 0:
        rows, cols = NC, HW
        x2 = x.reshape(rows, cols)
        scale = jnp.tile(scale_c, N).reshape(rows, 1)
        shift = jnp.tile(shift_c, N).reshape(rows, 1)
        scale_per_row = True
    elif CHW % _LANE == 0:
        rows, cols = N, CHW
        x2 = x.reshape(rows, cols)
        scale = jnp.repeat(scale_c, HW).reshape(1, cols)
        shift = jnp.repeat(shift_c, HW).reshape(1, cols)
        scale_per_row = False
    else:
        # Pad H*W up to a multiple of 128 (keeps stores lane-dense and bounds block size).
        pad = (-HW) % _LANE
        rows, cols = NC, HW + pad
        x2 = jnp.pad(x.reshape(NC, HW), ((0, 0), (0, pad)))
        scale = jnp.tile(scale_c, N).reshape(rows, 1)
        shift = jnp.tile(shift_c, N).reshape(rows, 1)
        scale_per_row = True

    row_tile, lane_tile = _choose_tiles(rows, cols, itemsize, target_block_bytes)
    grid = (pl.cdiv(rows, row_tile), pl.cdiv(cols, lane_tile))

    # ---- VMEM budget: double-buffered x/out blocks + padded scale/shift sidecars. ----
    x_block_bytes = row_tile * lane_tile * itemsize
    if scale_per_row:
        sidecar_bytes = row_tile * _LANE * 4       # (row_tile, 1) f32 pads lanes to 128
    else:
        sidecar_bytes = 8 * lane_tile * 4          # (1, lane_tile) f32 pads sublanes to 8
    vmem_need = 2 * (2 * x_block_bytes) + 2 * (2 * sidecar_bytes)
    vmem_limit = int(min(_VMEM_LIMIT_CAP, max(24 * _MB, vmem_need + 8 * _MB)))

    if scale_per_row:
        ss_spec = pl.BlockSpec((row_tile, 1), lambda r, h: (r, 0))
    else:
        ss_spec = pl.BlockSpec((1, lane_tile), lambda r, h: (0, h))
    x_spec = pl.BlockSpec((row_tile, lane_tile), lambda r, h: (r, h))

    out2 = pl.pallas_call(
        fbn_kernel,
        out_shape=jax.ShapeDtypeStruct((rows, cols), x.dtype),
        grid_spec=pltpu.PrefetchScalarGridSpec(
            num_scalar_prefetch=0,
            grid=grid,
            in_specs=[ss_spec, ss_spec, x_spec],
            out_specs=x_spec,
        ),
        compiler_params=pltpu.CompilerParams(
            dimension_semantics=("parallel", "parallel"),
            vmem_limit_bytes=vmem_limit,
        ),
    )(scale, shift, x2)

    if pad:
        out2 = out2[:, :HW]
    return out2.reshape(N, C, H, W)


def frozen_batch_norm_2d_ref(x, weight, bias, running_mean, running_var):
    w = weight.reshape(1, -1, 1, 1)
    b = bias.reshape(1, -1, 1, 1)
    rv = running_var.reshape(1, -1, 1, 1)
    rm = running_mean.reshape(1, -1, 1, 1)
    scale = w * lax.rsqrt(rv + EPS)
    return (x.astype(jnp.float32) * scale + (b - rm * scale)).astype(x.dtype)


def _make_inputs(key, N, C, H, W, dtype=jnp.float32):
    kx, kw, kb, km, kv = jax.random.split(key, 5)
    x = jax.random.normal(kx, (N, C, H, W), dtype=dtype)
    weight = jnp.ones((C,), jnp.float32) + 0.1 * jax.random.normal(kw, (C,), jnp.float32)
    bias = jnp.zeros((C,), jnp.float32) + 0.1 * jax.random.normal(kb, (C,), jnp.float32)
    running_mean = 0.1 * jax.random.normal(km, (C,), jnp.float32)
    running_var = jnp.ones((C,), jnp.float32) + 0.1 * jax.random.uniform(kv, (C,), jnp.float32)
    return x, weight, bias, running_mean, running_var


if __name__ == "__main__":
    key = jax.random.PRNGKey(0)
    k1, k2, k3 = jax.random.split(key, 3)

    # Primary (module-implied) case: HW % 128 == 0 -> path A.
    x, w, b, rm, rv = _make_inputs(k1, 2, 4, 16, 16)
    out = jax.block_until_ready(frozen_batch_norm_2d(x, w, b, rm, rv))
    ref = frozen_batch_norm_2d_ref(x, w, b, rm, rv)
    assert out.shape == x.shape and out.dtype == x.dtype
    assert jnp.allclose(out, ref, atol=1e-5, rtol=1e-5), "path A mismatch vs reference"

    # ResNet-style odd HW with C a multiple of 128 -> path B (lane-dense over C*H*W).
    x, w, b, rm, rv = _make_inputs(k2, 2, 128, 7, 7)
    out = jax.block_until_ready(frozen_batch_norm_2d(x, w, b, rm, rv))
    ref = frozen_batch_norm_2d_ref(x, w, b, rm, rv)
    assert jnp.allclose(out, ref, atol=1e-5, rtol=1e-5), "path B mismatch vs reference"

    # Odd HW and odd C*H*W -> path C (padded lanes).
    x, w, b, rm, rv = _make_inputs(k3, 2, 4, 7, 7)
    out = jax.block_until_ready(frozen_batch_norm_2d(x, w, b, rm, rv))
    ref = frozen_batch_norm_2d_ref(x, w, b, rm, rv)
    assert jnp.allclose(out, ref, atol=1e-5, rtol=1e-5), "path C mismatch vs reference"

    print("KERNEL_OK")
</pallas_src>

<mosaic_0001>
module attributes {stable_mosaic.version = 11 : i64} {
  func.func @fbn_kernel(%arg0: i32, %arg1: i32, %arg2: memref<8x1xf32, #tpu.memory_space<vmem>>, %arg3: memref<8x1xf32, #tpu.memory_space<vmem>>, %arg4: memref<8x256xf32, #tpu.memory_space<vmem>>, %arg5: memref<8x256xf32, #tpu.memory_space<vmem>>) attributes {dimension_semantics = [#tpu.dimension_semantics<parallel>, #tpu.dimension_semantics<parallel>], iteration_bounds = array<i64: 1, 1>, scalar_prefetch = 0 : i64, scratch_operands = 0 : i64, tpu.core_type = #tpu.core_type<tc>, window_params = [{transform_indices = @transform_0, window_bounds = array<i64: 8, 1>}, {transform_indices = @transform_1, window_bounds = array<i64: 8, 1>}, {transform_indices = @transform_2, window_bounds = array<i64: 8, 256>}, {transform_indices = @transform_3, window_bounds = array<i64: 8, 256>}]} {
    %c0 = arith.constant 0 : index
    %c0_0 = arith.constant 0 : index
    %0 = vector.load %arg4[%c0, %c0_0] : memref<8x256xf32, #tpu.memory_space<vmem>>, vector<8x256xf32>
    %c0_1 = arith.constant 0 : index
    %c0_2 = arith.constant 0 : index
    %1 = vector.load %arg2[%c0_1, %c0_2] : memref<8x1xf32, #tpu.memory_space<vmem>>, vector<8x1xf32>
    %2 = vector.broadcast %1 : vector<8x1xf32> to vector<8x256xf32>
    %3 = arith.mulf %0, %2 : vector<8x256xf32>
    %c0_3 = arith.constant 0 : index
    %c0_4 = arith.constant 0 : index
    %4 = vector.load %arg3[%c0_3, %c0_4] : memref<8x1xf32, #tpu.memory_space<vmem>>, vector<8x1xf32>
    %5 = vector.broadcast %4 : vector<8x1xf32> to vector<8x256xf32>
    %6 = arith.addf %3, %5 : vector<8x256xf32>
    %c0_5 = arith.constant 0 : index
    %c0_6 = arith.constant 0 : index
    %7 = vector.load %arg5[%c0_5, %c0_6] : memref<8x256xf32, #tpu.memory_space<vmem>>, vector<8x256xf32>
    tpu.vector_store %arg5[%c0_5, %c0_6], %6 {strides = array<i32>} : memref<8x256xf32, #tpu.memory_space<vmem>>, vector<8x256xf32>,
    return
  }
  func.func @transform_0(%arg0: i32, %arg1: i32) -> (i32, i32) {
    %c0_i32 = arith.constant 0 : i32
    %c0_i32_0 = arith.constant 0 : i32
    return %arg0, %c0_i32 : i32, i32
  }
  func.func @transform_1(%arg0: i32, %arg1: i32) -> (i32, i32) {
    %c0_i32 = arith.constant 0 : i32
    %c0_i32_0 = arith.constant 0 : i32
    return %arg0, %c0_i32 : i32, i32
  }
  func.func @transform_2(%arg0: i32, %arg1: i32) -> (i32, i32) {
    %c0_i32 = arith.constant 0 : i32
    return %arg0, %arg1 : i32, i32
  }
  func.func @transform_3(%arg0: i32, %arg1: i32) -> (i32, i32) {
    %c0_i32 = arith.constant 0 : i32
    return %arg0, %arg1 : i32, i32
  }
}

</mosaic_0001>

<bundles_post_ra>
// kernel: tpu_custom_call.1
= control target key start
LH: loop header
LB: loop body
LE: loop exit
PB: predicated region body
PF: predicated region fallthrough
CT: control target
= control target key end

     0   :  { %s122_s0 = inlined_call_operand.vmem [shape: f32[8,1], index: 0, kind: input, shape index: {}]   ;;  %s123_s1 = inlined_call_operand.vmem [shape: f32[8,1], index: 1, kind: input, shape index: {}]   ;;  %s124_s2 = inlined_call_operand.vmem [shape: f32[8,256], index: 2, kind: input, shape index: {}]   ;;  %s125_s3 = inlined_call_operand.hbm [shape: f32[8,256], index: 3, kind: output, shape index: {}]  }
   0x1   :  { %v17_v0 = vld [vmem:[%s122_s0] sm:$0xff] }
   0x2   :  { %8 = vsyncpa [#allocation3], 0  ;;  %v76_v1 = vmov 0   ;;  %v25_v2 = vld [vmem:[%s123_s1] sm:$0xff]  ;;  %v16_v5 = vld [vmem:[%s124_s2 + $0x8] sm:$0xff]  ;;  %s77_s20 = smov [#allocation2]  }
   0x3   :  { %51 = vset.pattern.permute.xlu0 %v76_v1  ;;  %v15_v4 = vld [vmem:[%s124_s2] sm:$0xff]  ;;  %s41_s0 = sshll.u32 %s77_s20, 4  ;;  %s42_s0 = int_to_ptr.vmem [resolvable:$true] %s41_s0 }
   0x4   :  { %20 = vperm.xlu0 %51, %v17_v0   ;;  %s52_s1 = scalar_lea.vmem %s42_s0, 256  ;;  %p57_p1 = scmp.lt.s32.totalorder %s42_s0, %s42_s0 }
   0x5   :  { %p53_p0 = scmp.ne.s32.totalorder %s42_s0, %s52_s1  ;;  %p58_p2 = scmp.lt.s32.totalorder %s52_s1, %s52_s1 }
   0x7   :  { %p59_p3 = por %p58_p2, %p57_p1 }
   0x8   :  { %28 = vperm.xlu0 %51, %v25_v2  }
   0x9   :  { %p60_p4 = pnand %p59_p3, %p53_p0 }
  0x83   :  { %v21_v3 = vpop.permute.xlu0 %20 }
  0x84   :  { %v23_v6 = vmul.f32 %v21_v3, %v15_v4  ;;  %v24_v7 = vmul.f32 %v21_v3, %v16_v5 }
  0x87   :  { %v29_v8 = vpop.permute.xlu0 %28 }
  0x88   :  { %v31_v9 = vadd.f32 %v29_v8, %v23_v6  ;;  %v32_v10 = vadd.f32 %v29_v8, %v24_v7 }
  0x8a   :  { %33 = vst [vmem:[#allocation2] sm:$0xff] %v31_v9  ;;  %34 = vst [vmem:[#allocation2 + $0x8] sm:$0xff] %v32_v10 }
  0x8b   :  { %63 = shalt.err (!%p60_p4)
}
  0x8c   :  { %s64_s2 = scalar_lea.hbm %s125_s3, 256 }
  0x8d   :  { %p65_p5 = scmp.ne.s32.totalorder %s125_s3, %s64_s2  ;;  %p68_p6 = scmp.lt.u32.totalorder %s64_s2, %s125_s3 }
  0x8f   :  { %p70_p7 = pnand %p68_p6, %p65_p5 }
  0x91   :  { %73 = shalt.err (!%p70_p7)
}
  0x92   :  { %44 = dma.vmem_to_hbm [thread:$0]  %s42_s0, 256, %s125_s3, [#allocation3]  }
  0x93   :  { %74 = dma.done.wait [#allocation3], 256  }
  0x94   :  { %75 = vsyncadd [#allocation3], 4294967040 }
  0x95   :  { %48 = vsyncpa [#allocation3], 1 }

</bundles_post_ra>
